<compile_context>
chip_gen: v6e
topology: v6e:2x2x1
jax: 0.10.0
libtpu: 0.0.40
codegen_flags: <defaults>
</compile_context>

<pallas_src>
import functools

import jax
import jax.numpy as jnp
from jax.experimental import pallas as pl
from jax.experimental.pallas import tpu as pltpu


def _tv_kernel(x_ref, m_ref, o_ref, *, img_h, img_w, bc, tb):
    # x_ref: (TB, H*W) block of flattened image planes (one plane per row),
    #        in the source dtype; upcast to f32 in-kernel.
    # m_ref: (2, H*W) f32 masks, already scaled by 1/count_h and 1/count_w.
    # o_ref: (1, 8, 128) per-block partial-sum tile (scalar broadcast so the
    #        store is a full, unmasked lane-dense vst).
    x = x_ref[...].astype(jnp.float32)                 # (TB, HW)
    m = m_ref[...]                                     # (2, HW)

    part = None
    if img_h > 1:
        # x[i] - x[i - W]  ==  x[r, c] - x[r - 1, c], valid for r >= 1.
        dh = x - pltpu.roll(x, img_w, axis=1)
        part = dh * dh * m[0:1, :]
    if img_w > 1:
        # x[i] - x[i - 1]  ==  x[r, c] - x[r, c - 1], valid for c >= 1.
        dw = x - pltpu.roll(x, 1, axis=1)
        t = dw * dw * m[1:2, :]
        part = t if part is None else part + t
    if part is None:                                   # degenerate 1x1 images
        part = jnp.zeros_like(x)

    if bc % tb != 0:
        # Partial last block: select-mask out-of-range rows (select, not
        # multiply, so garbage NaN/Inf in the OOB region cannot leak in).
        row = (jax.lax.broadcasted_iota(jnp.int32, (tb, 1), 0)
               + pl.program_id(0) * tb)
        part = jnp.where(row < bc, part, 0.0)

    o_ref[...] = jnp.full(o_ref.shape, jnp.sum(part), dtype=jnp.float32)


def tv_loss(x, tvloss_weight=1.0):
    """Total-variation loss matching the PyTorch TVLoss.forward semantics."""
    b, c, h, w = x.shape
    bc = b * c
    hw = h * w

    itemsize = x.dtype.itemsize
    sub = max(8, 32 // itemsize)          # sublane tile: 8 f32 / 16 bf16 / 32 i8
    plane_bytes = hw * itemsize

    # Rows (planes) per grid step: ~2 MiB of source-dtype input per step,
    # rounded to the sublane tile, and capped so large inputs still produce
    # >= ~8 grid steps (pipelining + megacore sharding).
    # TODO(synk): planes larger than ~2 MiB each (f32 > ~724x724) should be
    # tiled over a second grid axis instead of a single (sub, H*W) block.
    if bc <= sub:
        tb = bc                            # block == full row extent (legal)
    else:
        target_bytes = 2 * 1024 * 1024
        tb = max(sub, (target_bytes // plane_bytes) // sub * sub)
        cap = ((pl.cdiv(bc, 8) + sub - 1) // sub) * sub
        tb = min(tb, cap)
    num_blocks = pl.cdiv(bc, tb)

    # No wrapper-side padding: reshape is metadata-only, tail rows (if any)
    # are masked in-kernel.
    x_flat = x.reshape(bc, hw)

    # Pre-scaled validity masks, built once as (2, H*W) f32 rows so the
    # kernel does zero per-element iota/mod/compare work.
    count_h = c * (h - 1) * w
    count_w = c * h * (w - 1)
    col = jnp.arange(hw, dtype=jnp.int32)
    if h > 1:
        wh = (col >= w).astype(jnp.float32) / count_h
    else:
        wh = jnp.zeros((hw,), jnp.float32)
    if w > 1:
        ww = (col % w != 0).astype(jnp.float32) / count_w
    else:
        ww = jnp.zeros((hw,), jnp.float32)
    masks = jnp.stack([wh, ww], axis=0)    # (2, HW)

    # Scoped-VMEM budget: double-buffered source input + f32 temporaries
    # (cast, dh, dw, fused term), capped at 48 MiB (v7x has 64 MiB physical).
    block_bytes = tb * hw * itemsize
    f32_block = tb * hw * 4
    vmem_limit = int(min(48 * 1024 * 1024,
                         max(32 * 1024 * 1024,
                             2 * block_bytes + 5 * f32_block)))

    kernel = functools.partial(_tv_kernel, img_h=h, img_w=w, bc=bc, tb=tb)

    parts = pl.pallas_call(
        kernel,
        out_shape=jax.ShapeDtypeStruct((num_blocks, 8, 128), jnp.float32),
        grid_spec=pltpu.PrefetchScalarGridSpec(
            num_scalar_prefetch=0,
            grid=(num_blocks,),
            in_specs=[
                pl.BlockSpec((tb, hw), lambda i: (i, 0)),
                pl.BlockSpec((2, hw), lambda i: (0, 0)),
            ],
            out_specs=pl.BlockSpec((1, 8, 128), lambda i: (i, 0, 0)),
        ),
        compiler_params=pltpu.CompilerParams(
            dimension_semantics=("parallel",),   # disjoint partials per step
            vmem_limit_bytes=vmem_limit,
        ),
    )(x_flat, masks)

    total = jnp.sum(parts[:, 0, 0])            # tiny (num_blocks,) reduce
    return tvloss_weight * 2.0 * total / b


if __name__ == "__main__":
    key = jax.random.PRNGKey(0)
    x = jax.random.normal(key, (2, 4, 16, 16), dtype=jnp.float32)

    out = jax.block_until_ready(tv_loss(x, tvloss_weight=1.0))

    # Pure-JAX reference matching TVLoss.forward.
    b, c, h, w = x.shape
    xf = x.astype(jnp.float32)
    h_tv_ref = jnp.sum((xf[:, :, 1:, :] - xf[:, :, :-1, :]) ** 2)
    w_tv_ref = jnp.sum((xf[:, :, :, 1:] - xf[:, :, :, :-1]) ** 2)
    count_h = c * (h - 1) * w
    count_w = c * h * (w - 1)
    ref = 1.0 * 2.0 * (h_tv_ref / count_h + w_tv_ref / count_w) / b

    assert jnp.allclose(out, ref, rtol=1e-5, atol=1e-5), (out, ref)
    print("KERNEL_OK")
</pallas_src>

<mosaic_0001>
module attributes {stable_mosaic.version = 11 : i64} {
  func.func @_tv_kernel(%arg0: i32, %arg1: memref<8x256xf32, #tpu.memory_space<vmem>>, %arg2: memref<2x256xf32, #tpu.memory_space<vmem>>, %arg3: memref<1x8x128xf32, #tpu.memory_space<vmem>>) attributes {dimension_semantics = [#tpu.dimension_semantics<parallel>], iteration_bounds = array<i64: 1>, scalar_prefetch = 0 : i64, scratch_operands = 0 : i64, tpu.core_type = #tpu.core_type<tc>, window_params = [{transform_indices = @transform_0, window_bounds = array<i64: 8, 256>}, {pipeline_mode = #tpu.pipeline_mode<synchronous>, transform_indices = @transform_1, window_bounds = array<i64: 2, 256>}, {transform_indices = @transform_2, window_bounds = array<i64: 1, 8, 128>}]} {
    %c0 = arith.constant 0 : index
    %c0_0 = arith.constant 0 : index
    %0 = vector.load %arg1[%c0, %c0_0] : memref<8x256xf32, #tpu.memory_space<vmem>>, vector<8x256xf32>
    %c0_1 = arith.constant 0 : index
    %c0_2 = arith.constant 0 : index
    %1 = vector.load %arg2[%c0_1, %c0_2] : memref<2x256xf32, #tpu.memory_space<vmem>>, vector<2x256xf32>
    %c16_i32 = arith.constant 16 : i32
    %2 = tpu.dynamic_rotate %0 by %c16_i32 dim 1 : vector<8x256xf32>, i32 -> vector<8x256xf32>
    %3 = arith.subf %0, %2 : vector<8x256xf32>
    %4 = arith.mulf %3, %3 : vector<8x256xf32>
    %5 = vector.extract_strided_slice %1 {offsets = [0, 0], sizes = [1, 256], strides = [1, 1]} : vector<2x256xf32> to vector<1x256xf32>
    %6 = vector.broadcast %5 : vector<1x256xf32> to vector<8x256xf32>
    %7 = arith.mulf %4, %6 : vector<8x256xf32>
    %c1_i32 = arith.constant 1 : i32
    %8 = tpu.dynamic_rotate %0 by %c1_i32 dim 1 : vector<8x256xf32>, i32 -> vector<8x256xf32>
    %9 = arith.subf %0, %8 : vector<8x256xf32>
    %10 = arith.mulf %9, %9 : vector<8x256xf32>
    %11 = vector.extract_strided_slice %1 {offsets = [1, 0], sizes = [1, 256], strides = [1, 1]} : vector<2x256xf32> to vector<1x256xf32>
    %12 = vector.broadcast %11 : vector<1x256xf32> to vector<8x256xf32>
    %13 = arith.mulf %10, %12 : vector<8x256xf32>
    %14 = arith.addf %7, %13 : vector<8x256xf32>
    %15 = vector.shape_cast %14 : vector<8x256xf32> to vector<1x8x256xf32>
    %cst = arith.constant dense<0.000000e+00> : vector<1xf32>
    %16 = vector.multi_reduction <add>, %15, %cst [1, 2] : vector<1x8x256xf32> to vector<1xf32>
    %17 = vector.shape_cast %16 : vector<1xf32> to vector<1x1x1xf32>
    %18 = vector.extract %17[0, 0, 0] : f32 from vector<1x1x1xf32>
    %19 = vector.broadcast %18 : f32 to vector<1x8x128xf32>
    %c0_3 = arith.constant 0 : index
    %c0_4 = arith.constant 0 : index
    %c0_5 = arith.constant 0 : index
    %20 = vector.load %arg3[%c0_3, %c0_4, %c0_5] : memref<1x8x128xf32, #tpu.memory_space<vmem>>, vector<1x8x128xf32>
    tpu.vector_store %arg3[%c0_3, %c0_4, %c0_5], %19 {strides = array<i32>} : memref<1x8x128xf32, #tpu.memory_space<vmem>>, vector<1x8x128xf32>,
    return
  }
  func.func @transform_0(%arg0: i32) -> (i32, i32) {
    %c0_i32 = arith.constant 0 : i32
    %c0_i32_0 = arith.constant 0 : i32
    return %arg0, %c0_i32 : i32, i32
  }
  func.func @transform_1(%arg0: i32) -> (i32, i32) {
    %c0_i32 = arith.constant 0 : i32
    %c0_i32_0 = arith.constant 0 : i32
    %c0_i32_1 = arith.constant 0 : i32
    return %c0_i32, %c0_i32_0 : i32, i32
  }
  func.func @transform_2(%arg0: i32) -> (i32, i32, i32) {
    %c0_i32 = arith.constant 0 : i32
    %c0_i32_0 = arith.constant 0 : i32
    %c0_i32_1 = arith.constant 0 : i32
    return %arg0, %c0_i32, %c0_i32_0 : i32, i32, i32
  }
}

</mosaic_0001>

<bundles_post_ra>
// kernel: tpu_custom_call.1
= control target key start
LH: loop header
LB: loop body
LE: loop exit
PB: predicated region body
PF: predicated region fallthrough
CT: control target
= control target key end

     0   :  { %7 = vsyncpa [#allocation3], 0  ;;  %s236_s0 = inlined_call_operand.hbm [shape: f32[8,256], index: 0, kind: input, shape index: {}]   ;;  %s237_s1 = inlined_call_operand.hbm [shape: f32[2,256], index: 1, kind: input, shape index: {}]   ;;  %s238_s2 = inlined_call_operand.hbm [shape: f32[1,8,128], index: 2, kind: output, shape index: {}]  }
   0x1   :  { %8 = vsyncpa [#allocation6], 0 }
   0x2   :  { %9 = vsyncpa [#allocation4], 0  ;;  %s207_s9 = smov [#allocation2]   ;;  %s208_s11 = smov [#allocation5]  }
   0x3   :  { %s16_s10 = sshll.u32 %s207_s9, 4  ;;  %s26_s12 = sshll.u32 %s208_s11, 4  ;;  %s17_s10 = int_to_ptr.vmem [resolvable:$true] %s16_s10  ;;  %s27_s12 = int_to_ptr.vmem [resolvable:$true] %s26_s12 }
   0x4   :  { %s149_s13 = scalar_lea.vmem %s17_s10, 256  ;;  %p154_p1 = scmp.lt.s32.totalorder %s17_s10, %s17_s10 }
   0x5   :  { %p150_p0 = scmp.ne.s32.totalorder %s17_s10, %s149_s13  ;;  %p155_p2 = scmp.lt.s32.totalorder %s149_s13, %s149_s13 }
   0x7   :  { %p156_p3 = por %p155_p2, %p154_p1 }
   0x9   :  { %p157_p4 = pnand %p156_p3, %p150_p0 }
   0xb   :  { %160 = shalt.err (!%p157_p4)
}
   0xc   :  { %19 = dma.hbm_to_vmem [thread:$0]  %s236_s0, 256, %s17_s10, [#allocation3]  }
   0xd   :  { %s169_s16 = scalar_lea.vmem %s27_s12, 64  ;;  %p174_p6 = scmp.lt.s32.totalorder %s27_s12, %s27_s12 }
   0xe   :  { %p170_p5 = scmp.ne.s32.totalorder %s27_s12, %s169_s16  ;;  %p175_p7 = scmp.lt.s32.totalorder %s169_s16, %s169_s16 }
  0x10   :  { %p176_p8 = por %p175_p7, %p174_p6 }
  0x12   :  { %p177_p9 = pnand %p176_p8, %p170_p5 }
  0x14   :  { %180 = shalt.err (!%p177_p9)
}
  0x15   :  { %29 = dma.hbm_to_vmem [thread:$0]  %s237_s1, 64, %s27_s12, [#allocation6]  }
  0x16   :  { %201 = dma.done.wait [#allocation3], 256  }
  0x17   :  { %202 = vsyncadd [#allocation3], 4294967040 }
  0x18   :  { %203 = dma.done.wait [#allocation6], 64  }
  0x19   :  { %204 = vsyncadd [#allocation6], 4294967232  ;;  %v36_v0 = vld [vmem:[#allocation2] sm:$0xff]  ;;  %s209_s19 = smov 1   ;;  %s210_s20 = smov 16   ;;  %v37_v1 = vld [vmem:[#allocation2 + $0x8] sm:$0xff]  ;;  %v43_v2 = vlaneseq }
  0x1a   :  { %73 = vrot.lane.b32.xlu1 %v36_v0, %s209_s19  ;;  %39 = vrot.lane.b32.xlu0 %v36_v0, %s210_s20  ;;  %v38_v8 = vld [vmem:[#allocation5] sm:$0xf]  ;;  %s211_s0 = smov [#allocation7]  }
  0x1b   :  { %v54_v3 = vshrl.u32 %v43_v2, 7  ;;  %v44_v9 = vand.u32 127, %v43_v2  ;;  %s124_s1 = sshll.u32 %s211_s0, 4  ;;  %s125_s1 = int_to_ptr.vmem [resolvable:$true] %s124_s1 }
  0x1c   :  { %s181_s22 = scalar_lea.vmem %s125_s1, 128  ;;  %p186_p11 = scmp.lt.s32.totalorder %s125_s1, %s125_s1 }
  0x1d   :  { %v86_v4 = vsub.s32 1, %v54_v3  ;;  %v90_v5 = vsub.s32 3, %v54_v3  ;;  %v55_v6 = vsub.s32 0, %v54_v3  ;;  %v59_v7 = vsub.s32 2, %v54_v3  ;;  %p182_p10 = scmp.ne.s32.totalorder %s125_s1, %s181_s22  ;;  %p187_p12 = scmp.lt.s32.totalorder %s181_s22, %s181_s22 }
  0x1e   :  { %75 = vrot.lane.b32.xlu1 %v37_v1, %s209_s19  ;;  %41 = vrot.lane.b32.xlu0 %v37_v1, %s210_s20  ;;  %vm77_vm0 = vcmp.lt.s32.totalorder %v44_v9, 1  ;;  %vm45_vm1 = vcmp.lt.s32.totalorder %v44_v9, 16 }
  0x1f   :  { %v87_v12 = vrot.slane %v38_v8, %v86_v4  ;;  %v91_v13 = vrot.slane %v38_v8, %v90_v5  ;;  %v56_v14 = vrot.slane %v38_v8, %v55_v6  ;;  %v60_v15 = vrot.slane %v38_v8, %v59_v7  ;;  %p188_p13 = por %p187_p12, %p186_p11 }
  0x21   :  { %v97_v16 = vrot.slane %v87_v12, %v86_v4  ;;  %v101_v17 = vrot.slane %v91_v13, %v86_v4  ;;  %v66_v19 = vrot.slane %v56_v14, %v55_v6  ;;  %v70_v20 = vrot.slane %v60_v15, %v55_v6  ;;  %p189_p0 = pnand %p188_p13, %p182_p10 }
  0x8c   :  { %v74_v10 = vpop.permute.xlu1 %73  ;;  %v40_v11 = vpop.permute.xlu0 %39 }
  0x90   :  { %v76_v18 = vpop.permute.xlu1 %75  ;;  %v42_v21 = vpop.permute.xlu0 %41 }
  0x91   :  { %v78_v22 = vsel %vm77_vm0, %v74_v10, %v76_v18  ;;  %v79_v23 = vsel %vm77_vm0, %v76_v18, %v74_v10  ;;  %v46_v24 = vsel %vm45_vm1, %v40_v11, %v42_v21  ;;  %v47_v25 = vsel %vm45_vm1, %v42_v21, %v40_v11 }
  0x92   :  { %v80_v26 = vsub.f32 %v36_v0, %v79_v23  ;;  %v81_v27 = vsub.f32 %v37_v1, %v78_v22  ;;  %v48_v28 = vsub.f32 %v36_v0, %v47_v25  ;;  %v49_v29 = vsub.f32 %v37_v1, %v46_v24 }
  0x94   :  { %v82_v30 = vmul.f32 %v80_v26, %v80_v26  ;;  %v83_v31 = vmul.f32 %v81_v27, %v81_v27  ;;  %v50_v32 = vmul.f32 %v48_v28, %v48_v28  ;;  %v51_v33 = vmul.f32 %v49_v29, %v49_v29 }
  0x96   :  { %v102_v34 = vmul.f32 %v97_v16, %v82_v30  ;;  %v103_v35 = vmul.f32 %v101_v17, %v83_v31  ;;  %v71_v36 = vmul.f32 %v66_v19, %v50_v32  ;;  %v72_v37 = vmul.f32 %v70_v20, %v51_v33 }
  0x98   :  { %v104_v38 = vadd.f32 %v102_v34, %v71_v36  ;;  %v105_v39 = vadd.f32 %v103_v35, %v72_v37 }
  0x9a   :  { %v106_v40 = vadd.f32 %v105_v39, %v104_v38 }
  0x9c   :  { %107 = vadd.xlane.f32.xlu0 %v106_v40 }
 0x125   :  { %v108_v41 = vpop.xlane.xlu0 %107 }
 0x126   :  { %v109_v42 = vrot.slane %v108_v41, 4 }
 0x128   :  { %v110_v43 = vadd.f32 %v109_v42, %v108_v41 }
 0x12a   :  { %v111_v44 = vrot.slane %v110_v43, 2 }
 0x12c   :  { %v112_v45 = vadd.f32 %v111_v44, %v110_v43 }
 0x12e   :  { %v113_v46 = vrot.slane %v112_v45, 1 }
 0x130   :  { %v114_v47 = vadd.f32 %v113_v46, %v112_v45 }
 0x132   :  { %134 = vpush %v114_v47 }
 0x163   :  { %s135_s21 = spop %134 }
 0x164   :  { %v116_v48 = vstv %s135_s21 }
 0x165   :  { %117 = vst [vmem:[#allocation7] sm:$0xff] %v116_v48 }
 0x166   :  { %192 = shalt.err (!%p189_p0)
}
 0x167   :  { %127 = dma.vmem_to_hbm [thread:$0]  %s125_s1, 128, %s238_s2, [#allocation4]  }
 0x168   :  { %205 = dma.done.wait [#allocation4], 128  }
 0x169   :  { %206 = vsyncadd [#allocation4], 4294967168 }
 0x16a   :  { %131 = vsyncpa [#allocation3], 1 }
 0x16b   :  { %132 = vsyncpa [#allocation6], 1 }
 0x16c   :  { %133 = vsyncpa [#allocation4], 1 }

</bundles_post_ra>
